<compile_context>
chip_gen: v7x
topology: tpu7x:2x2x1
jax: 0.10.0
libtpu: 0.0.40
codegen_flags: <defaults>
</compile_context>

<pallas_src>
import jax
import jax.numpy as jnp
from jax.experimental import pallas as pl
from jax.experimental.pallas import tpu as pltpu


def _alias_noop_kernel(x_hbm_ref, o_hbm_ref):
    # Identity with an aliased output: the output buffer *is* the input buffer,
    # so there is nothing to move.  Intentionally empty (no DMA, no VMEM).
    del x_hbm_ref, o_hbm_ref


def _hbm_copy_kernel(x_hbm_ref, o_hbm_ref, copy_sem):
    # Whole-slab HBM->HBM DMA: skips VMEM staging and all vector load/store
    # work on the TensorCore entirely.
    cp = pltpu.make_async_copy(x_hbm_ref, o_hbm_ref, copy_sem)
    cp.start()
    cp.wait()


def block_forward(x, *, alias_input=False):
    """Pallas kernel reproducing Block.forward(x) == x.

    alias_input=False (default, safe for any caller): the output is a fresh
        buffer filled by one HBM->HBM DMA — one read + one write of the
        tensor, the minimum for a non-aliased result.

    alias_input=True (zero data movement): the output aliases the input buffer
        and the kernel body moves nothing.  The caller MUST donate x
        (e.g. jax.jit(fn, donate_argnums=0)); without donation XLA silently
        inserts a defensive full copy of x, negating the benefit.
    """
    out_shape = jax.ShapeDtypeStruct(x.shape, x.dtype)

    if alias_input:
        return pl.pallas_call(
            _alias_noop_kernel,
            out_shape=out_shape,
            in_specs=[pl.BlockSpec(memory_space=pl.ANY)],
            out_specs=pl.BlockSpec(memory_space=pl.ANY),
            input_output_aliases={0: 0},
        )(x)

    return pl.pallas_call(
        _hbm_copy_kernel,
        out_shape=out_shape,
        in_specs=[pl.BlockSpec(memory_space=pl.ANY)],
        out_specs=pl.BlockSpec(memory_space=pl.ANY),
        scratch_shapes=[pltpu.SemaphoreType.DMA],
    )(x)


def init_block_params(key, in_features, out_features, kernel=3):
    """Deterministic parameter init matching Block.__init__ shapes.

    These parameters are NOT used by forward() (which is identity); they are
    constructed only to mirror the PyTorch module's constructor.
    """
    k_conv_w, k_conv_b = jax.random.split(key)
    return {
        "conv_weight": jax.random.normal(
            k_conv_w, (out_features, in_features, kernel, kernel), jnp.float32
        ) * 0.02,
        "conv_bias": jax.random.normal(k_conv_b, (out_features,), jnp.float32) * 0.02,
        "bn_gamma": jnp.ones((out_features,), jnp.float32),
        "bn_beta": jnp.zeros((out_features,), jnp.float32),
        "bn_running_mean": jnp.zeros((out_features,), jnp.float32),
        "bn_running_var": jnp.ones((out_features,), jnp.float32),
    }


if __name__ == "__main__":
    key = jax.random.PRNGKey(0)
    k_x, k_p = jax.random.split(key)

    # Small shapes consistent with the module: batch=2, channels=4, 16x16 spatial.
    N, C, H, W = 2, 4, 16, 16
    x = jax.random.normal(k_x, (N, C, H, W), jnp.float32)

    # Parameters from __init__ (unused by forward, kept for shape fidelity).
    params = init_block_params(k_p, in_features=C, out_features=8, kernel=3)

    # Path 1 (default): non-aliased output via a single HBM->HBM DMA.
    y = jax.block_until_ready(block_forward(x))
    assert y.shape == x.shape and y.dtype == x.dtype
    assert bool(jnp.all(y == x))

    # Path 2: zero-data-movement aliased path with a donated input buffer.
    fwd_donated = jax.jit(
        lambda t: block_forward(t, alias_input=True), donate_argnums=0
    )
    x_donor = jnp.array(x, copy=True)  # fresh device buffer we may donate
    y2 = jax.block_until_ready(fwd_donated(x_donor))
    assert y2.shape == x.shape and y2.dtype == x.dtype
    assert bool(jnp.all(y2 == x))

    print("KERNEL_OK")
</pallas_src>

<mosaic_0001>
module attributes {stable_mosaic.version = 11 : i64} {
  func.func @_hbm_copy_kernel(%arg0: memref<2x4x16x16xf32, #tpu.memory_space<any>>, %arg1: memref<2x4x16x16xf32, #tpu.memory_space<any>>, %arg2: memref<!tpu.dma_semaphore, #tpu.memory_space<semaphore_mem>>) attributes {dimension_semantics = [], scalar_prefetch = 0 : i64, scratch_operands = 1 : i64, tpu.core_type = #tpu.core_type<tc>} {
    tpu.enqueue_dma source(%arg0 : memref<2x4x16x16xf32, #tpu.memory_space<any>>) target(%arg1 : memref<2x4x16x16xf32, #tpu.memory_space<any>>) target_semaphore(%arg2 : memref<!tpu.dma_semaphore, #tpu.memory_space<semaphore_mem>>)
    tpu.wait_dma2 semaphore(%arg2 : memref<!tpu.dma_semaphore, #tpu.memory_space<semaphore_mem>>) src(%arg0 : memref<2x4x16x16xf32, #tpu.memory_space<any>>) dst(%arg1 : memref<2x4x16x16xf32, #tpu.memory_space<any>>)
    return
  }
}

</mosaic_0001>

<bundles_post_ra>
// kernel: tpu_custom_call.1
= control target key start
LH: loop header
LB: loop body
LE: loop exit
PB: predicated region body
PF: predicated region fallthrough
CT: control target
= control target key end

     0   :  { %s36_s6 = smov [#allocation2]   ;;  %s37_s7 = smov [#allocation3]   ;;  %s55_s0 = inlined_call_operand.hbm [shape: f32[2,4,16,16], index: 0, kind: input, shape index: {}]   ;;  %s56_s1 = inlined_call_operand.hbm [shape: f32[2,4,16,16], index: 1, kind: output, shape index: {}]  }
   0x1   :  { %s38_s8 = smov 0  }
   0x2   :  { %18 = dma.general %s55_s0, 2048, %s56_s1, %s36_s6, %s37_s7, [#allocation4], %s38_s8, 0  }
   0x3   :  { %34 = dma.done.wait [#allocation2], 2048 }
   0x4   :  { %35 = vsyncadd [#allocation2], 4294965248 }
   0x5   :  { %24 = vsyncmov [#allocation2] }
   0x8   :  { %s25_s13 = vpop.sfrf %24 }
   0x9   :  { %p30_p0 = scmp.ne.s32.totalorder %s25_s13, 0 }
   0xb   :  { %29 = shalt.err (%p30_p0)  }

</bundles_post_ra>
